<compile_context>
chip_gen: v7x
topology: tpu7x:2x2x1
jax: 0.10.0
libtpu: 0.0.40
codegen_flags: <defaults>
</compile_context>

<pallas_src>
import functools
import numpy as np
import jax
import jax.numpy as jnp
from jax.experimental import pallas as pl
from jax.experimental.pallas import tpu as pltpu


# ---------------------------------------------------------------------------
# One-shot kernel: sample the stochastic weight / bias (hoisted out of grid).
# ---------------------------------------------------------------------------
def _sample_params_kernel(w_ref, wr_ref, wn_ref, b_ref, br_ref, bn_ref,
                          wout_ref, bout_ref):
    # std = |rho|^1.5 == a * sqrt(a)  (one EUP sqrt + VPU mul; avoids pow chain)
    aw = jnp.abs(wr_ref[...])
    w_noisy = w_ref[...] + wn_ref[...] * (aw * jnp.sqrt(aw))
    wout_ref[...] = w_noisy.astype(wout_ref.dtype)          # bf16 for the MXU

    ab = jnp.abs(br_ref[...])
    bout_ref[...] = (b_ref[...] + bn_ref[...] * (ab * jnp.sqrt(ab))
                     ).astype(bout_ref.dtype)                # bias stays f32


# ---------------------------------------------------------------------------
# Conv kernel: one zero-padded image per grid step; KH*KW shifted taps are
# formed in VMEM (static slices) and accumulated as bf16 MXU matmuls into f32.
# ---------------------------------------------------------------------------
def _stoch_conv_kernel(x_ref, w_ref, b_ref, o_ref, *, KH, KW, OH, OW, Cin):
    acc = None
    for kh in range(KH):
        for kw in range(KW):
            # shifted tap of the padded image: (OH, OW, Cin) -> (OH*OW, Cin)
            tap = x_ref[0, kh:kh + OH, kw:kw + OW, :]
            tap2d = tap.reshape(OH * OW, Cin).astype(jnp.bfloat16)
            part = jnp.dot(tap2d, w_ref[kh * KW + kw],
                           preferred_element_type=jnp.float32)
            acc = part if acc is None else acc + part
    o_ref[0] = (acc + b_ref[...]).astype(o_ref.dtype)        # (OH*OW, Cout_p)


def stoch_conv2d(x_nchw, weight, bias, weight_rho, bias_rho, w_noise, b_noise,
                 *, padding=1):
    N, Cin, H, W = x_nchw.shape
    Cout, Cin_w, KH, KW = weight.shape
    assert Cin_w == Cin
    # TODO(synk): stride/dilation/groups other than the nn.Conv2d defaults
    # (1, 1, 1) and bias=None are not implemented in this kernel.
    OH = H + 2 * padding - KH + 1
    OW = W + 2 * padding - KW + 1
    Hp, Wp = H + 2 * padding, W + 2 * padding
    Cout_p = ((Cout + 127) // 128) * 128        # lane-dense output channels

    # ---- glue (plain JAX): layout + zero padding only; NO im2col in HBM ----
    x_nhwc = jnp.transpose(x_nchw, (0, 2, 3, 1))
    xpad = jnp.pad(x_nhwc, ((0, 0), (padding, padding), (padding, padding), (0, 0)))

    def to_taps(t):        # (Cout, Cin, KH, KW) -> (KH*KW, Cin, Cout_p)
        t = jnp.transpose(t, (2, 3, 1, 0)).reshape(KH * KW, Cin, Cout)
        return jnp.pad(t, ((0, 0), (0, 0), (0, Cout_p - Cout)))

    def to_row(t):         # (Cout,) -> (1, Cout_p)
        return jnp.pad(t.reshape(1, Cout), ((0, 0), (0, Cout_p - Cout)))

    w3, wr3, wn3 = to_taps(weight), to_taps(weight_rho), to_taps(w_noise)
    b2, br2, bn2 = to_row(bias), to_row(bias_rho), to_row(b_noise)

    # ---- stochastic parameters: computed exactly once (hoisted out of grid) ----
    # TODO(synk): noise could be generated in-kernel via pltpu.prng_seed +
    # pltpu.prng_random_bits; it is kept host-side (jax.random) so the
    # correctness check below can reuse the sampled values.
    w_noisy, b_noisy = pl.pallas_call(
        _sample_params_kernel,
        out_shape=(jax.ShapeDtypeStruct((KH * KW, Cin, Cout_p), jnp.bfloat16),
                   jax.ShapeDtypeStruct((1, Cout_p), jnp.float32)),
    )(w3, wr3, wn3, b2, br2, bn2)

    # ---- hot path: one padded image per grid step (whole image fits VMEM for
    # these shapes; large H*W would block over output rows with a KH-1 halo). ----
    kernel = functools.partial(_stoch_conv_kernel,
                               KH=KH, KW=KW, OH=OH, OW=OW, Cin=Cin)
    out3 = pl.pallas_call(
        kernel,
        out_shape=jax.ShapeDtypeStruct((N, OH * OW, Cout_p), jnp.float32),
        grid_spec=pltpu.PrefetchScalarGridSpec(
            num_scalar_prefetch=0,
            grid=(N,),                       # N even -> balanced across v7x's 2 TCs
            in_specs=[
                pl.BlockSpec((1, Hp, Wp, Cin), lambda n: (n, 0, 0, 0)),
                # grid-invariant sampled weight / bias: tiny after hoisting
                # (KH*KW x Cin x Cout_p bf16), so default buffering is fine.
                pl.BlockSpec((KH * KW, Cin, Cout_p), lambda n: (0, 0, 0)),
                pl.BlockSpec((1, Cout_p), lambda n: (0, 0)),
            ],
            out_specs=pl.BlockSpec((1, OH * OW, Cout_p), lambda n: (n, 0, 0)),
        ),
        compiler_params=pltpu.CompilerParams(
            dimension_semantics=("parallel",)),
    )(xpad, w_noisy, b_noisy)

    # back to PyTorch NCHW, dropping the lane-padding channels
    out = out3[:, :, :Cout].reshape(N, OH, OW, Cout)
    return jnp.transpose(out, (0, 3, 1, 2))


if __name__ == "__main__":
    # shapes consistent with an nn.Conv2d(4, 8, kernel_size=3, padding=1) mother
    N, Cin, H, W = 2, 4, 16, 16
    Cout, KH, KW = 8, 3, 3
    weight_v = bias_v = 0.01                     # StochConv2d defaults
    rho_val = weight_v ** (1.0 / 3.0)            # _var_to_rho

    key = jax.random.PRNGKey(0)
    kx, kw, kb, knw, knb = jax.random.split(key, 5)

    x = jax.random.normal(kx, (N, Cin, H, W), dtype=jnp.float32)
    weight = 0.1 * jax.random.normal(kw, (Cout, Cin, KH, KW), dtype=jnp.float32)
    bias = 0.1 * jax.random.normal(kb, (Cout,), dtype=jnp.float32)
    weight_rho = jnp.full(weight.shape, rho_val, dtype=jnp.float32)
    bias_rho = jnp.full(bias.shape, rho_val, dtype=jnp.float32)

    # the torch.randn(...) draws of the forward pass (deterministic here)
    w_noise = jax.random.normal(knw, weight.shape, dtype=jnp.float32)
    b_noise = jax.random.normal(knb, bias.shape, dtype=jnp.float32)

    out = stoch_conv2d(x, weight, bias, weight_rho, bias_rho, w_noise, b_noise)
    out = jax.block_until_ready(out)

    # reference: same stochastic conv via XLA in f32 (kernel uses bf16 MXU operands)
    rand_w = weight + w_noise * jnp.abs(weight_rho) ** 1.5
    rand_b = bias + b_noise * jnp.abs(bias_rho) ** 1.5
    ref = jax.lax.conv_general_dilated(
        x, rand_w, window_strides=(1, 1), padding=((1, 1), (1, 1)),
        dimension_numbers=("NCHW", "OIHW", "NCHW"),
        precision=jax.lax.Precision.HIGHEST) + rand_b[None, :, None, None]

    assert out.shape == (N, Cout, H, W)
    np.testing.assert_allclose(np.asarray(out), np.asarray(ref), rtol=2e-2, atol=2e-2)
    print("KERNEL_OK")
</pallas_src>

<mosaic_0001>
module attributes {stable_mosaic.version = 11 : i64} {
  func.func @_sample_params_kernel(%arg0: memref<9x4x128xf32, #tpu.memory_space<vmem>>, %arg1: memref<9x4x128xf32, #tpu.memory_space<vmem>>, %arg2: memref<9x4x128xf32, #tpu.memory_space<vmem>>, %arg3: memref<1x128xf32, #tpu.memory_space<vmem>>, %arg4: memref<1x128xf32, #tpu.memory_space<vmem>>, %arg5: memref<1x128xf32, #tpu.memory_space<vmem>>, %arg6: memref<9x4x128xbf16, #tpu.memory_space<vmem>>, %arg7: memref<1x128xf32, #tpu.memory_space<vmem>>) attributes {dimension_semantics = [], scalar_prefetch = 0 : i64, scratch_operands = 0 : i64, tpu.core_type = #tpu.core_type<tc>} {
    %c0 = arith.constant 0 : index
    %c0_0 = arith.constant 0 : index
    %c0_1 = arith.constant 0 : index
    %0 = vector.load %arg1[%c0, %c0_0, %c0_1] : memref<9x4x128xf32, #tpu.memory_space<vmem>>, vector<9x4x128xf32>
    %1 = math.absf %0 : vector<9x4x128xf32>
    %c0_2 = arith.constant 0 : index
    %c0_3 = arith.constant 0 : index
    %c0_4 = arith.constant 0 : index
    %2 = vector.load %arg0[%c0_2, %c0_3, %c0_4] : memref<9x4x128xf32, #tpu.memory_space<vmem>>, vector<9x4x128xf32>
    %c0_5 = arith.constant 0 : index
    %c0_6 = arith.constant 0 : index
    %c0_7 = arith.constant 0 : index
    %3 = vector.load %arg2[%c0_5, %c0_6, %c0_7] : memref<9x4x128xf32, #tpu.memory_space<vmem>>, vector<9x4x128xf32>
    %4 = math.sqrt %1 : vector<9x4x128xf32>
    %5 = arith.mulf %1, %4 : vector<9x4x128xf32>
    %6 = arith.mulf %3, %5 : vector<9x4x128xf32>
    %7 = arith.addf %2, %6 : vector<9x4x128xf32>
    %8 = arith.truncf %7 : vector<9x4x128xf32> to vector<9x4x128xbf16>
    %c0_8 = arith.constant 0 : index
    %c0_9 = arith.constant 0 : index
    %c0_10 = arith.constant 0 : index
    %9 = vector.load %arg6[%c0_8, %c0_9, %c0_10] : memref<9x4x128xbf16, #tpu.memory_space<vmem>>, vector<9x4x128xbf16>
    tpu.vector_store %arg6[%c0_8, %c0_9, %c0_10], %8 {strides = array<i32>} : memref<9x4x128xbf16, #tpu.memory_space<vmem>>, vector<9x4x128xbf16>,
    %c0_11 = arith.constant 0 : index
    %c0_12 = arith.constant 0 : index
    %10 = vector.load %arg4[%c0_11, %c0_12] : memref<1x128xf32, #tpu.memory_space<vmem>>, vector<1x128xf32>
    %11 = math.absf %10 : vector<1x128xf32>
    %c0_13 = arith.constant 0 : index
    %c0_14 = arith.constant 0 : index
    %12 = vector.load %arg3[%c0_13, %c0_14] : memref<1x128xf32, #tpu.memory_space<vmem>>, vector<1x128xf32>
    %c0_15 = arith.constant 0 : index
    %c0_16 = arith.constant 0 : index
    %13 = vector.load %arg5[%c0_15, %c0_16] : memref<1x128xf32, #tpu.memory_space<vmem>>, vector<1x128xf32>
    %14 = math.sqrt %11 : vector<1x128xf32>
    %15 = arith.mulf %11, %14 : vector<1x128xf32>
    %16 = arith.mulf %13, %15 : vector<1x128xf32>
    %17 = arith.addf %12, %16 : vector<1x128xf32>
    %c0_17 = arith.constant 0 : index
    %c0_18 = arith.constant 0 : index
    %18 = vector.load %arg7[%c0_17, %c0_18] : memref<1x128xf32, #tpu.memory_space<vmem>>, vector<1x128xf32>
    tpu.vector_store %arg7[%c0_17, %c0_18], %17 {strides = array<i32>} : memref<1x128xf32, #tpu.memory_space<vmem>>, vector<1x128xf32>,
    return
  }
}

</mosaic_0001>

<bundles_post_ra>
// kernel: tpu_custom_call.1
= control target key start
LH: loop header
LB: loop body
LE: loop exit
PB: predicated region body
PF: predicated region fallthrough
CT: control target
= control target key end

     0   :  { %13 = vsyncpa [#allocation3], 0  ;;  %s650_s0 = inlined_call_operand.hbm [shape: f32[9,4,128], index: 0, kind: input, shape index: {}]   ;;  %s651_s1 = inlined_call_operand.hbm [shape: f32[9,4,128], index: 1, kind: input, shape index: {}]   ;;  %s652_s2 = inlined_call_operand.hbm [shape: f32[9,4,128], index: 2, kind: input, shape index: {}]   ;;  %s653_s3 = inlined_call_operand.vmem [shape: f32[1,128], index: 3, kind: input, shape index: {}]   ;;  %s654_s4 = inlined_call_operand.vmem [shape: f32[1,128], index: 4, kind: input, shape index: {}]   ;;  %s655_s5 = inlined_call_operand.vmem [shape: f32[1,128], index: 5, kind: input, shape index: {}]   ;;  %s656_s6 = inlined_call_operand.hbm [shape: bf16[9,4,128], index: 6, kind: output, shape index: {0}]   ;;  %s657_s7 = inlined_call_operand.hbm [shape: f32[1,128], index: 7, kind: output, shape index: {1}]  }
   0x1   :  { %14 = vsyncpa [#allocation6], 0 }
   0x2   :  { %15 = vsyncpa [#allocation4], 0 }
   0x3   :  { %16 = vsyncpa [#allocation10], 0  ;;  %s406_s24 = smov [#allocation5]   ;;  %s407_s26 = smov [#allocation2]  }
   0x4   :  { %s34_s25 = sshll.u32 %s406_s24, 4  ;;  %s22_s27 = sshll.u32 %s407_s26, 4  ;;  %s35_s25 = int_to_ptr.vmem [resolvable:$true] %s34_s25  ;;  %s455_s27 = int_to_ptr.vmem [resolvable:$true] %s22_s27 }
   0x5   :  { %s288_s30 = scalar_lea.hbm %s651_s1, 576 }
   0x6   :  { %p289_p0 = scmp.ne.s32.totalorder %s651_s1, %s288_s30  ;;  %p292_p1 = scmp.lt.u32.totalorder %s288_s30, %s651_s1 }
   0x8   :  { %p294_p2 = pnand %p292_p1, %p289_p0 }
   0xa   :  { %297 = shalt.err (!%p294_p2)
}
   0xb   :  { %s298_s12 = scalar_lea.vmem %s35_s25, 576  ;;  %p303_p4 = scmp.lt.s32.totalorder %s35_s25, %s35_s25 }
   0xc   :  { %p299_p3 = scmp.ne.s32.totalorder %s35_s25, %s298_s12  ;;  %p304_p5 = scmp.lt.s32.totalorder %s298_s12, %s298_s12 }
   0xe   :  { %p305_p6 = por %p304_p5, %p303_p4 }
  0x10   :  { %p306_p7 = pnand %p305_p6, %p299_p3 }
  0x12   :  { %309 = shalt.err (!%p306_p7)
}
  0x13   :  { %s408_s13 = smov 64   ;;  %s409_s14 = smov 4  }
  0x14   :  { %40 = dma.hbm_to_vmem [thread:$0]  %s651_s1, 576, %s35_s25, [#allocation6], %s408_s13, %s408_s13, %s409_s14  }
  0x15   :  { %s310_s19 = scalar_lea.hbm %s650_s0, 576 }
  0x16   :  { %p311_p8 = scmp.ne.s32.totalorder %s650_s0, %s310_s19  ;;  %p314_p9 = scmp.lt.u32.totalorder %s310_s19, %s650_s0 }
  0x18   :  { %p316_p10 = pnand %p314_p9, %p311_p8 }
  0x1a   :  { %319 = shalt.err (!%p316_p10)
}
  0x1b   :  { %s320_s24 = scalar_lea.vmem %s455_s27, 576  ;;  %p325_p12 = scmp.lt.s32.totalorder %s455_s27, %s455_s27 }
  0x1c   :  { %p321_p11 = scmp.ne.s32.totalorder %s455_s27, %s320_s24  ;;  %p326_p13 = scmp.lt.s32.totalorder %s320_s24, %s320_s24 }
  0x1e   :  { %p327_p0 = por %p326_p13, %p325_p12 }
  0x20   :  { %p328_p1 = pnand %p327_p0, %p321_p11 }
  0x22   :  { %331 = shalt.err (!%p328_p1)
}
  0x23   :  { %28 = dma.hbm_to_vmem [thread:$0]  %s650_s0, 576, %s455_s27, [#allocation3], %s408_s13, %s408_s13, %s409_s14  }
  0x24   :  { %s410_s26 = smov [#allocation7]   ;;  %s332_s8 = scalar_lea.hbm %s652_s2, 576 }
  0x25   :  { %s46_s28 = sshll.u32 %s410_s26, 4  ;;  %p333_p2 = scmp.ne.s32.totalorder %s652_s2, %s332_s8  ;;  %s47_s28 = int_to_ptr.vmem [resolvable:$true] %s46_s28 }
  0x26   :  { %p336_p3 = scmp.lt.u32.totalorder %s332_s8, %s652_s2 }
  0x28   :  { %p338_p4 = pnand %p336_p3, %p333_p2 }
  0x2a   :  { %341 = shalt.err (!%p338_p4)
}
  0x2b   :  { %s342_s15 = scalar_lea.vmem %s47_s28, 576  ;;  %p347_p6 = scmp.lt.s32.totalorder %s47_s28, %s47_s28 }
  0x2c   :  { %p343_p5 = scmp.ne.s32.totalorder %s47_s28, %s342_s15  ;;  %p348_p7 = scmp.lt.s32.totalorder %s342_s15, %s342_s15 }
  0x2e   :  { %p349_p8 = por %p348_p7, %p347_p6 }
  0x30   :  { %p350_p9 = pnand %p349_p8, %p343_p5 }
  0x32   :  { %353 = shalt.err (!%p350_p9)
}
  0x33   :  { %52 = dma.hbm_to_vmem [thread:$0]  %s652_s2, 576, %s47_s28, [#allocation6], %s408_s13, %s408_s13, %s409_s14  }
  0x34   :  { %398 = dma.done.wait [#allocation3], 576  }
  0x35   :  { %399 = vsyncadd [#allocation3], 4294966720 }
  0x36   :  { %400 = dma.done.wait [#allocation6], 1152  }
  0x37   :  { %401 = vsyncadd [#allocation6], 4294966144  ;;  %v68_v0 = vld [vmem:[#allocation5] sm:$0xf]  ;;  %v69_v2 = vld [vmem:[#allocation5 + $0x4] sm:$0xf] }
  0x38   :  { %v77_v1 = vand.u32 2147483647, %v68_v0  ;;  %v78_v3 = vand.u32 2147483647, %v69_v2  ;;  %v70_v4 = vld [vmem:[#allocation5 + $0x8] sm:$0xf] }
  0x39   :  { %v507_v5 = vand.u32 2147483647, %v70_v4  ;;  %v71_v6 = vld [vmem:[#allocation5 + $0xc] sm:$0xf]  ;;  %v72_v8 = vld [vmem:[#allocation5 + $0x10] sm:$0xf] }
  0x3a   :  { %268 = vrsqrt.f32 %v77_v1  ;;  %v509_v7 = vand.u32 2147483647, %v71_v6  ;;  %vm106_vm0 = vcmp.eq.f32.partialorder %v77_v1, inf  ;;  %v513_v9 = vand.u32 2147483647, %v72_v8  ;;  %s411_s16 = smov [#allocation8]  }
  0x3b   :  { %270 = vrsqrt.f32 %v78_v3  ;;  %v73_v10 = vld [vmem:[#allocation5 + $0x14] sm:$0xf]  ;;  %vm108_vm1 = vcmp.eq.f32.partialorder %v77_v1, 0.0  ;;  %v109_v11 = vand.u32 2147483648, %v77_v1  ;;  %v74_v13 = vld [vmem:[#allocation5 + $0x18] sm:$0xf] }
  0x3c   :  { %272 = vrsqrt.f32 %v507_v5  ;;  %v515_v12 = vand.u32 2147483647, %v73_v10  ;;  %vm113_vm2 = vcmp.eq.f32.partialorder %v78_v3, inf  ;;  %vm115_vm3 = vcmp.eq.f32.partialorder %v78_v3, 0.0  ;;  %v75_v18 = vld [vmem:[#allocation5 + $0x1c] sm:$0xf] }
  0x3d   :  { %274 = vrsqrt.f32 %v509_v7  ;;  %v116_v14 = vand.u32 2147483648, %v78_v3  ;;  %vm120_vm4 = vcmp.eq.f32.partialorder %v507_v5, inf  ;;  %vm122_vm5 = vcmp.eq.f32.partialorder %v507_v5, 0.0  ;;  %v76_v25 = vld [vmem:[#allocation5 + $0x20] sm:$0xf]  ;;  %s232_s17 = sshll.u32 %s411_s16, 4  ;;  %s233_s17 = int_to_ptr.vmem [resolvable:$true] %s232_s17 }
  0x3e   :  { %276 = vrsqrt.f32 %v513_v9  ;;  %v123_v15 = vand.u32 2147483648, %v507_v5  ;;  %vm127_vm6 = vcmp.eq.f32.partialorder %v509_v7, inf  ;;  %vm129_vm7 = vcmp.eq.f32.partialorder %v509_v7, 0.0  ;;  %v95_v28 = vld [vmem:[#allocation7] sm:$0xf]  ;;  %s412_s20 = smov [#allocation9]   ;;  %p359_p11 = scmp.lt.s32.totalorder %s233_s17, %s233_s17 }
  0x3f   :  { %278 = vrsqrt.f32 %v515_v12  ;;  %v524_v17 = vand.u32 2147483647, %v74_v13  ;;  %v130_v21 = vand.u32 2147483648, %v509_v7  ;;  %vm134_vm8 = vcmp.eq.f32.partialorder %v513_v9, inf  ;;  %v212_v32 = vld [vmem:[%s654_s4] sm:$0x1] }
  0x40   :  { %v528_v22 = vand.u32 2147483647, %v75_v18  ;;  %vm136_vm9 = vcmp.eq.f32.partialorder %v513_v9, 0.0  ;;  %v137_v24 = vand.u32 2147483648, %v513_v9  ;;  %vm141_vm10 = vcmp.eq.f32.partialorder %v515_v12, inf  ;;  %s245_s21 = sshll.u32 %s412_s20, 4  ;;  %s618_s21 = int_to_ptr.vmem [resolvable:$true] %s245_s21 }
  0x41   :  { %280 = vrsqrt.f32 %v524_v17  ;;  %vm143_vm11 = vcmp.eq.f32.partialorder %v515_v12, 0.0  ;;  %v144_v31 = vand.u32 2147483648, %v515_v12  ;;  %vm148_vm12 = vcmp.eq.f32.partialorder %v524_v17, inf  ;;  %v96_v35 = vld [vmem:[#allocation7 + $0x4] sm:$0xf] }
  0x42   :  { %282 = vrsqrt.f32 %v528_v22  ;;  %v546_v38 = vand.u32 2147483647, %v76_v25  ;;  %v86_v39 = vld [vmem:[#allocation2] sm:$0xf]  ;;  %vm150_vm13 = vcmp.eq.f32.partialorder %v524_v17, 0.0  ;;  %v151_v42 = vand.u32 2147483648, %v524_v17 }
  0x43   :  { %v87_v44 = vld [vmem:[#allocation2 + $0x4] sm:$0xf]  ;;  %v555_v46 = vand.u32 2147483647, %v212_v32  ;;  %v97_v49 = vld [vmem:[#allocation7 + $0x8] sm:$0xf] }
  0x44   :  { %v269_v16 = vpop.eup %268  ;;  %284 = vrsqrt.f32 %v546_v38  ;;  %vm155_vm14 = vcmp.eq.f32.partialorder %v528_v22, inf  ;;  %v98_v55 = vld [vmem:[#allocation7 + $0xc] sm:$0xf]  ;;  %v88_v59 = vld [vmem:[#allocation2 + $0x8] sm:$0xf]  ;;  %v158_v62 = vand.u32 2147483648, %v528_v22 }
  0x45   :  { %v271_v19 = vpop.eup %270  ;;  %v105_v20 = vmul.f32 %v269_v16, %v77_v1  ;;  %286 = vrsqrt.f32 %v555_v46  ;;  %v99_v6 = vld [vmem:[#allocation7 + $0x10] sm:$0xf]  ;;  %vm157_vm15 = vcmp.eq.f32.partialorder %v528_v22, 0.0  ;;  %v91_v25 = vld [vmem:[#allocation2 + $0x14] sm:$0xf] }
  0x46   :  { %v112_v23 = vmul.f32 %v271_v19, %v78_v3  ;;  %v273_v27 = vpop.eup %272  ;;  %v90_v19 = vld [vmem:[#allocation2 + $0x10] sm:$0xf] }
  0x47   :  { %v107_v26 = vsel %vm106_vm0, %v77_v1, %v105_v20  ;;  %v275_v33 = vpop.eup %274  ;;  %v119_v37 = vmul.f32 %v273_v27, %v507_v5  ;;  %vm162_vm0 = vcmp.eq.f32.partialorder %v546_v38, inf }
  0x48   :  { %v110_v29 = vsel %vm108_vm1, %v109_v11, %v107_v26  ;;  %v114_v30 = vsel %vm113_vm2, %v78_v3, %v112_v23  ;;  %v126_v41 = vmul.f32 %v275_v33, %v509_v7  ;;  %v277_v47 = vpop.eup %276  ;;  %v102_v33 = vld [vmem:[#allocation7 + $0x1c] sm:$0xf]  ;;  %vm164_vm1 = vcmp.eq.f32.partialorder %v546_v38, 0.0 }
  0x49   :  { %v167_v34 = vmul.f32 %v110_v29, %v77_v1  ;;  %v117_v36 = vsel %vm115_vm3, %v116_v14, %v114_v30  ;;  %v121_v45 = vsel %vm120_vm4, %v507_v5, %v119_v37  ;;  %v279_v52 = vpop.eup %278  ;;  %v133_v57 = vmul.f32 %v277_v47, %v513_v9  ;;  %v89_v1 = vld [vmem:[#allocation2 + $0xc] sm:$0xf]  ;;  %v100_v14 = vld [vmem:[#allocation7 + $0x14] sm:$0xf]  ;;  %v92_v37 = vld [vmem:[#allocation2 + $0x18] sm:$0xf] }
  0x4a   :  { %v168_v40 = vmul.f32 %v117_v36, %v78_v3  ;;  %v124_v50 = vsel %vm122_vm5, %v123_v15, %v121_v45  ;;  %v128_v51 = vsel %vm127_vm6, %v509_v7, %v126_v41  ;;  %v140_v61 = vmul.f32 %v279_v52, %v515_v12 }
  0x4b   :  { %v176_v43 = vmul.f32 %v167_v34, %v95_v28  ;;  %v169_v54 = vmul.f32 %v124_v50, %v507_v5  ;;  %v131_v56 = vsel %vm129_vm7, %v130_v21, %v128_v51  ;;  %v135_v2 = vsel %vm134_vm8, %v513_v9, %v133_v57  ;;  %v281_v3 = vpop.eup %280  ;;  %v101_v28 = vld [vmem:[#allocation7 + $0x18] sm:$0xf] }
  0x4c   :  { %v177_v48 = vmul.f32 %v168_v40, %v96_v35  ;;  %v170_v60 = vmul.f32 %v131_v56, %v509_v7  ;;  %v138_v7 = vsel %vm136_vm9, %v137_v24, %v135_v2  ;;  %v142_v8 = vsel %vm141_vm10, %v515_v12, %v140_v61  ;;  %v283_v10 = vpop.eup %282 }
  0x4d   :  { %v185_v53 = vadd.f32 %v176_v43, %v86_v39  ;;  %v178_v0 = vmul.f32 %v169_v54, %v97_v49  ;;  %v171_v13 = vmul.f32 %v138_v7, %v513_v9  ;;  %v145_v15 = vsel %vm143_vm11, %v144_v31, %v142_v8  ;;  %v93_v43 = vld [vmem:[#allocation2 + $0x1c] sm:$0xf]  ;;  %v103_v49 = vld [vmem:[#allocation7 + $0x20] sm:$0xf] }
  0x4e   :  { %v186_v58 = vadd.f32 %v177_v48, %v87_v44  ;;  %v179_v5 = vmul.f32 %v170_v60, %v98_v55  ;;  %v147_v16 = vmul.f32 %v281_v3, %v524_v17  ;;  %v172_v20 = vmul.f32 %v145_v15, %v515_v12  ;;  %v285_v30 = vpop.eup %284  ;;  %v94_v55 = vld [vmem:[#allocation2 + $0x20] sm:$0xf] }
  0x4f   :  { %v194_v63 = vpack.c.bf16 %v185_v53, %v185_v53  ;;  %v187_v11 = vadd.f32 %v178_v0, %v88_v59  ;;  %v154_v21 = vmul.f32 %v283_v10, %v528_v22  ;;  %v180_v24 = vmul.f32 %v171_v13, %v99_v6  ;;  %v287_v47 = vpop.eup %286  ;;  %v215_v59 = vld [vmem:[%s655_s5] sm:$0x1]  ;;  %s354_s5 = scalar_lea.vmem %s233_s17, 288 }
  0x50   :  { %v195_v4 = vpack.c.bf16 %v186_v58, %v186_v58  ;;  %v188_v18 = vadd.f32 %v179_v5, %v89_v1  ;;  %v149_v9 = vsel %vm148_vm12, %v524_v17, %v147_v16  ;;  %v181_v27 = vmul.f32 %v172_v20, %v100_v14  ;;  %p355_p10 = scmp.ne.s32.totalorder %s233_s17, %s354_s5  ;;  %p360_p12 = scmp.lt.s32.totalorder %s354_s5, %s354_s5 }
  0x51   :  { %203 = vst [vmem:[#allocation8] sm:$0x3] %v194_v63  ;;  %v196_v23 = vpack.c.bf16 %v187_v11, %v187_v11  ;;  %v152_v29 = vsel %vm150_vm13, %v151_v42, %v149_v9  ;;  %v156_v12 = vsel %vm155_vm14, %v528_v22, %v154_v21  ;;  %v189_v31 = vadd.f32 %v180_v24, %v90_v19 }
  0x52   :  { %204 = vst [vmem:[#allocation8 + $0x2] sm:$0x3] %v195_v4  ;;  %v197_v26 = vpack.c.bf16 %v188_v18, %v188_v18  ;;  %v173_v32 = vmul.f32 %v152_v29, %v524_v17  ;;  %v159_v34 = vsel %vm157_vm15, %v158_v62, %v156_v12  ;;  %v165_v35 = vand.u32 2147483648, %v546_v38  ;;  %v214_v62 = vld [vmem:[%s653_s3] sm:$0x1]  ;;  %p361_p13 = por %p360_p12, %p359_p11 }
  0x53   :  { %205 = vst [vmem:[#allocation8 + $0x4] sm:$0x3] %v196_v23  ;;  %v190_v36 = vadd.f32 %v181_v27, %v91_v25  ;;  %v174_v39 = vmul.f32 %v159_v34, %v528_v22  ;;  %v161_v40 = vmul.f32 %v285_v30, %v546_v38  ;;  %v198_v41 = vpack.c.bf16 %v189_v31, %v189_v31 }
  0x54   :  { %206 = vst [vmem:[#allocation8 + $0x6] sm:$0x3] %v197_v26  ;;  %v182_v42 = vmul.f32 %v173_v32, %v101_v28  ;;  %vm218_vm2 = vcmp.eq.f32.partialorder %v555_v46, inf  ;;  %v221_v22 = vand.u32 2147483648, %v555_v46  ;;  %v217_v53 = vmul.f32 %v287_v47, %v555_v46  ;;  %p362_p0 = pnand %p361_p13, %p355_p10 }
  0x55   :  { %v199_v44 = vpack.c.bf16 %v190_v36, %v190_v36  ;;  %v183_v17 = vmul.f32 %v174_v39, %v102_v33  ;;  %v163_v45 = vsel %vm162_vm0, %v546_v38, %v161_v40  ;;  %207 = vst [vmem:[#allocation8 + $0x8] sm:$0x3] %v198_v41  ;;  %vm220_vm3 = vcmp.eq.f32.partialorder %v555_v46, 0.0 }
  0x56   :  { %v191_v48 = vadd.f32 %v182_v42, %v92_v37  ;;  %v166_v50 = vsel %vm164_vm1, %v165_v35, %v163_v45  ;;  %v219_v58 = vsel %vm218_vm2, %v555_v46, %v217_v53 }
  0x57   :  { %208 = vst [vmem:[#allocation8 + $0xa] sm:$0x3] %v199_v44  ;;  %v192_v51 = vadd.f32 %v183_v17, %v93_v43  ;;  %v175_v52 = vmul.f32 %v166_v50, %v546_v38  ;;  %v222_v60 = vsel %vm220_vm3, %v221_v22, %v219_v58 }
  0x58   :  { %v200_v54 = vpack.c.bf16 %v191_v48, %v191_v48  ;;  %v223_v61 = vmul.f32 %v222_v60, %v555_v46 }
  0x59   :  { %v201_v56 = vpack.c.bf16 %v192_v51, %v192_v51  ;;  %v184_v57 = vmul.f32 %v175_v52, %v103_v49 }
  0x5a   :  { %209 = vst [vmem:[#allocation8 + $0xc] sm:$0x3] %v200_v54  ;;  %v224_v0 = vmul.f32 %v223_v61, %v215_v59 }
  0x5b   :  { %210 = vst [vmem:[#allocation8 + $0xe] sm:$0x3] %v201_v56  ;;  %v193_v38 = vadd.f32 %v184_v57, %v94_v55 }
  0x5c   :  { %v225_v1 = vadd.f32 %v224_v0, %v214_v62 }
  0x5d   :  { %v202_v63 = vpack.c.bf16 %v193_v38, %v193_v38 }
  0x5f   :  { %211 = vst [vmem:[#allocation8 + $0x10] sm:$0x3] %v202_v63 }
  0x60   :  { %365 = shalt.err (!%p362_p0)
}
  0x61   :  { %s366_s3 = scalar_lea.hbm %s656_s6, 288 }
  0x62   :  { %p367_p1 = scmp.ne.s32.totalorder %s656_s6, %s366_s3  ;;  %p370_p2 = scmp.lt.u32.totalorder %s366_s3, %s656_s6 }
  0x64   :  { %p372_p3 = pnand %p370_p2, %p367_p1 }
  0x66   :  { %375 = shalt.err (!%p372_p3)
}
  0x67   :  { %s413_s28 = smov 32   ;;  %s414_s29 = smov 2   ;;  %226 = vst [vmem:[#allocation9] sm:$0x1] %v225_v1 }
  0x68   :  { %238 = dma.vmem_to_hbm [thread:$0]  %s233_s17, 288, %s656_s6, [#allocation4], %s413_s28, %s413_s28, %s414_s29  }
  0x69   :  { %s376_s9 = scalar_lea.vmem %s618_s21, 16  ;;  %s380_s10 = scalar_lea.vmem %s618_s21, 32 }
  0x6a   :  { %p377_p4 = scmp.ne.s32.totalorder %s618_s21, %s376_s9  ;;  %p381_p5 = scmp.lt.s32.totalorder %s618_s21, %s618_s21 }
  0x6b   :  { %p382_p6 = scmp.lt.s32.totalorder %s380_s10, %s376_s9 }
  0x6d   :  { %p383_p7 = por %p382_p6, %p381_p5 }
  0x6f   :  { %p384_p8 = pnand %p383_p7, %p377_p4 }
  0x71   :  { %387 = shalt.err (!%p384_p8)
}
  0x72   :  { %s388_s15 = scalar_lea.hbm %s657_s7, 16 }
  0x73   :  { %p389_p9 = scmp.ne.s32.totalorder %s657_s7, %s388_s15  ;;  %p392_p10 = scmp.lt.u32.totalorder %s388_s15, %s657_s7 }
  0x75   :  { %p394_p11 = pnand %p392_p10, %p389_p9 }
  0x77   :  { %397 = shalt.err (!%p394_p11)
}
  0x78   :  { %248 = dma.vmem_to_hbm [thread:$0]  %s618_s21, 16, %s657_s7, [#allocation10]  }
  0x79   :  { %402 = dma.done.wait [#allocation4], 288  }
  0x7a   :  { %403 = vsyncadd [#allocation4], 4294967008 }
  0x7b   :  { %404 = dma.done.wait [#allocation10], 16  }
  0x7c   :  { %405 = vsyncadd [#allocation10], 4294967280 }
  0x7d   :  { %255 = vsyncpa [#allocation3], 1 }
  0x7e   :  { %256 = vsyncpa [#allocation6], 1 }
  0x7f   :  { %257 = vsyncpa [#allocation4], 1 }
  0x80   :  { %258 = vsyncpa [#allocation10], 1 }

</bundles_post_ra>
